<compile_context>
chip_gen: v7x
topology: tpu7x:2x2x1
jax: 0.10.0
libtpu: 0.0.40
codegen_flags: <defaults>
</compile_context>

<pallas_src>
import functools

import jax
import jax.numpy as jnp
import numpy as np
from jax import lax
from jax.experimental import pallas as pl
from jax.experimental.pallas import tpu as pltpu

EPS = 1e-5


def _round_up(n, m):
    return ((n + m - 1) // m) * m


def _subgraph4state_kernel(x_ref, w1_ref, b1_ref, w2_ref, b2_ref, out_ref):
    # x_ref:  [TB, Cin] f32    w1_ref: [Cin, 64] f32   b1_ref: [1, 64] f32
    # w2_ref: [64, 256] matmul_dtype                   b2_ref: [1, 256] f32
    # out_ref: [TB, 256] out_dtype
    x = x_ref[...]
    w1 = w1_ref[...]
    cin = w1_ref.shape[0]

    # fc: Linear(Cin, 64). Cin is tiny (4) -> unrolled VPU broadcast-FMAs instead of an MXU
    # matmul with 4/256 contraction utilization.
    acc = x[:, 0:1] * w1[0:1, :]
    for c in range(1, cin):
        acc = acc + x[:, c:c + 1] * w1[c:c + 1, :]
    h = acc + b1_ref[...]                                       # [TB, 64] f32

    # layer_norm over the 64 features (normalized_shape=(1,64)): biased variance, eps inside rsqrt,
    # no affine — exactly F.layer_norm(x, x.size()[1:]). Fused with the following relu.
    mu = jnp.mean(h, axis=-1, keepdims=True)
    hm = h - mu
    var = jnp.mean(hm * hm, axis=-1, keepdims=True)
    hn = jnp.maximum(hm * lax.rsqrt(var + EPS), 0.0)            # [TB, 64] f32

    # fc2: Linear(64, 256) on the MXU. Operands in w2's dtype (pre-cast by the wrapper),
    # accumulation always f32; bias add + relu in f32; single cast on the store.
    y = jnp.dot(hn.astype(w2_ref.dtype), w2_ref[...], preferred_element_type=jnp.float32)
    y = y + b2_ref[...]
    out_ref[...] = jnp.maximum(y, 0.0).astype(out_ref.dtype)


def subgraph_net_4state(x, w1, b1, w2, b2, *, tile_b=4096, out_dtype=jnp.float32,
                        matmul_dtype=None, min_pallas_batch=1024):
    """x: [B, 1, C_in] (or [B, C_in]); returns [B, 256] in `out_dtype`.

    out_dtype:    dtype of the stored output. f32 = exact PyTorch parity; bf16 halves the
                  dominant HBM writeback traffic (~1.9x end-to-end when accuracy allows).
    matmul_dtype: operand dtype of the 64->256 MXU matmul (accumulation is always f32).
                  Defaults to w2.dtype; pass jnp.bfloat16 on v6e/v7x for ~2x MXU throughput.
    min_pallas_batch: below this batch size the forward runs as plain XLA ops (a pallas_call's
                  fixed launch cost dwarfs the work at tiny B). Pass 0 to force the kernel.
    """
    x2d = x.reshape(x.shape[0], x.shape[-1]) if x.ndim == 3 else x
    B, cin = x2d.shape
    hidden = w1.shape[1]
    n_out = w2.shape[1]
    if matmul_dtype is None:
        matmul_dtype = w2.dtype

    # Cast parameters once in the wrapper (not per grid step inside the kernel):
    # VPU/layernorm math stays f32 (v5e has no bf16 VPU/EUP); only the MXU operand may be bf16.
    w1f = w1.astype(jnp.float32)
    b1f = b1.reshape(1, hidden).astype(jnp.float32)
    w2m = w2.astype(matmul_dtype)
    b2f = b2.reshape(1, n_out).astype(jnp.float32)

    if B < min_pallas_batch:
        # Tiny-batch fallback: plain XLA (no kernel launch / pipeline-priming overhead).
        xf = x2d.astype(jnp.float32)
        h = xf @ w1f + b1f
        mu = jnp.mean(h, axis=-1, keepdims=True)
        var = jnp.mean((h - mu) ** 2, axis=-1, keepdims=True)
        hn = jnp.maximum((h - mu) * lax.rsqrt(var + EPS), 0.0)
        y = jnp.dot(hn.astype(matmul_dtype), w2m, preferred_element_type=jnp.float32) + b2f
        return jnp.maximum(y, 0.0).astype(out_dtype)

    x2d = x2d.astype(jnp.float32)

    # Batch tile: multiple of 8 (sublane alignment), capped by tile_b. Guarantee >= 2 grid steps
    # whenever B >= 16 so the "parallel" batch axis can shard across v7x's two TensorCores.
    b8 = _round_up(B, 8)
    tb = min(_round_up(tile_b, 8), b8)
    if b8 >= 16:
        tb = min(tb, _round_up(pl.cdiv(b8, 2), 8))
    b_pad = _round_up(B, tb)
    if b_pad != B:
        x2d = jnp.pad(x2d, ((0, b_pad - B), (0, 0)))   # zero rows are numerically safe
    grid = (b_pad // tb,)

    def weight_spec(a):
        return pl.BlockSpec(a.shape, lambda i: (0,) * a.ndim)   # resident across the grid

    out_item = jnp.dtype(out_dtype).itemsize
    weight_bytes = sum(int(a.size) * a.dtype.itemsize for a in (w1f, b1f, w2m, b2f))

    # Explicit scoped-VMEM budget: double-buffered x/out tiles + live f32 intermediates + weights,
    # with headroom. >= 32 MiB so large tiles don't hit v5e's 16 MiB default; capped well under
    # v7x's 64 MiB physical VMEM.
    vmem_needed = (2 * tb * cin * 4
                   + 2 * tb * n_out * out_item
                   + tb * (hidden + n_out) * 4
                   + 2 * weight_bytes)
    vmem_limit = int(min(max(2 * vmem_needed, 32 << 20), 48 << 20))

    cost = pl.CostEstimate(
        flops=2 * b_pad * (cin * hidden + hidden * n_out),
        transcendentals=0,
        bytes_accessed=(b_pad * (cin * 4 + n_out * out_item) + weight_bytes),
    )

    out = pl.pallas_call(
        _subgraph4state_kernel,
        out_shape=jax.ShapeDtypeStruct((b_pad, n_out), out_dtype),
        grid=grid,
        in_specs=[pl.BlockSpec((tb, cin), lambda i: (i, 0)),
                  weight_spec(w1f), weight_spec(b1f), weight_spec(w2m), weight_spec(b2f)],
        out_specs=pl.BlockSpec((tb, n_out), lambda i: (i, 0)),
        compiler_params=pltpu.CompilerParams(
            dimension_semantics=("parallel",),
            vmem_limit_bytes=vmem_limit),
        cost_estimate=cost,
    )(x2d, w1f, b1f, w2m, b2f)
    return out[:B]


def init_params(key, input_channels=4):
    k1, k2, k3, k4 = jax.random.split(key, 4)
    # kaiming_normal_ (fan_in, gain=sqrt(2)) for weights; PyTorch-default uniform biases.
    std1 = (2.0 / input_channels) ** 0.5
    std2 = (2.0 / 64) ** 0.5
    w1 = jax.random.normal(k1, (input_channels, 64), jnp.float32) * std1   # [in, out]
    w2 = jax.random.normal(k2, (64, 256), jnp.float32) * std2              # [in, out]
    b1 = jax.random.uniform(k3, (1, 64), jnp.float32,
                            -1.0 / input_channels ** 0.5, 1.0 / input_channels ** 0.5)
    b2 = jax.random.uniform(k4, (1, 256), jnp.float32, -1.0 / 8.0, 1.0 / 8.0)
    return w1, b1, w2, b2


def _reference(x, w1, b1, w2, b2):
    x2d = x.reshape(x.shape[0], x.shape[-1]).astype(jnp.float32)
    h = x2d @ w1 + b1
    mu = jnp.mean(h, axis=-1, keepdims=True)
    var = jnp.mean((h - mu) ** 2, axis=-1, keepdims=True)
    hn = jnp.maximum((h - mu) / jnp.sqrt(var + EPS), 0.0)
    return jnp.maximum(hn @ w2 + b2, 0.0)


if __name__ == "__main__":
    key = jax.random.PRNGKey(0)
    kx, kx2, kp = jax.random.split(key, 3)

    # Small shape implied by the module: batch=2, singleton "node" dim, 4 state channels.
    B, C_in = 2, 4
    x = jax.random.normal(kx, (B, 1, C_in), jnp.float32)
    w1, b1, w2, b2 = init_params(kp, C_in)
    ref = _reference(x, w1, b1, w2, b2)

    # 1) f32 Pallas path (exact semantics); min_pallas_batch=0 forces the kernel at tiny B.
    out = jax.block_until_ready(subgraph_net_4state(x, w1, b1, w2, b2, min_pallas_batch=0))
    assert out.shape == (B, 256), out.shape
    assert jnp.allclose(out, ref, atol=1e-4, rtol=1e-4), float(jnp.max(jnp.abs(out - ref)))

    # 2) Multi-block grid + padding + >=2 grid steps (B not a multiple of the tile).
    B2 = 300
    x2 = jax.random.normal(kx2, (B2, 1, C_in), jnp.float32)
    ref2 = _reference(x2, w1, b1, w2, b2)
    out2 = jax.block_until_ready(
        subgraph_net_4state(x2, w1, b1, w2, b2, tile_b=128, min_pallas_batch=0))
    assert out2.shape == (B2, 256), out2.shape
    assert jnp.allclose(out2, ref2, atol=1e-4, rtol=1e-4), float(jnp.max(jnp.abs(out2 - ref2)))

    # 3) Throughput config: bf16 output (halves HBM writeback) + bf16 MXU operands (f32 accumulate).
    out_bf = jax.block_until_ready(
        subgraph_net_4state(x2, w1, b1, w2, b2, tile_b=128, min_pallas_batch=0,
                            out_dtype=jnp.bfloat16, matmul_dtype=jnp.bfloat16))
    assert out_bf.dtype == jnp.bfloat16
    assert jnp.allclose(out_bf.astype(jnp.float32), ref2, atol=1e-1, rtol=5e-2), \
        float(jnp.max(jnp.abs(out_bf.astype(jnp.float32) - ref2)))

    # 4) Default tiny-batch dispatch takes the plain-XLA fallback (no kernel launch overhead).
    out_small = jax.block_until_ready(subgraph_net_4state(x, w1, b1, w2, b2))
    assert jnp.allclose(out_small, ref, atol=1e-4, rtol=1e-4)

    print("KERNEL_OK")
</pallas_src>

<mosaic_0001>
module attributes {stable_mosaic.version = 11 : i64} {
  func.func @_subgraph4state_kernel(%arg0: i32, %arg1: memref<8x4xf32, #tpu.memory_space<vmem>>, %arg2: memref<4x64xf32, #tpu.memory_space<vmem>>, %arg3: memref<1x64xf32, #tpu.memory_space<vmem>>, %arg4: memref<64x256xf32, #tpu.memory_space<vmem>>, %arg5: memref<1x256xf32, #tpu.memory_space<vmem>>, %arg6: memref<8x256xf32, #tpu.memory_space<vmem>>) attributes {dimension_semantics = [#tpu.dimension_semantics<parallel>], iteration_bounds = array<i64: 1>, scalar_prefetch = 0 : i64, scratch_operands = 0 : i64, tpu.core_type = #tpu.core_type<tc>, window_params = [{transform_indices = @transform_0, window_bounds = array<i64: 8, 4>}, {pipeline_mode = #tpu.pipeline_mode<synchronous>, transform_indices = @transform_1, window_bounds = array<i64: 4, 64>}, {pipeline_mode = #tpu.pipeline_mode<synchronous>, transform_indices = @transform_2, window_bounds = array<i64: 1, 64>}, {pipeline_mode = #tpu.pipeline_mode<synchronous>, transform_indices = @transform_3, window_bounds = array<i64: 64, 256>}, {pipeline_mode = #tpu.pipeline_mode<synchronous>, transform_indices = @transform_4, window_bounds = array<i64: 1, 256>}, {transform_indices = @transform_5, window_bounds = array<i64: 8, 256>}]} {
    %c0 = arith.constant 0 : index
    %c0_0 = arith.constant 0 : index
    %0 = vector.load %arg1[%c0, %c0_0] : memref<8x4xf32, #tpu.memory_space<vmem>>, vector<8x4xf32>
    %c0_1 = arith.constant 0 : index
    %c0_2 = arith.constant 0 : index
    %1 = vector.load %arg2[%c0_1, %c0_2] : memref<4x64xf32, #tpu.memory_space<vmem>>, vector<4x64xf32>
    %2 = vector.extract_strided_slice %0 {offsets = [0, 0], sizes = [8, 1], strides = [1, 1]} : vector<8x4xf32> to vector<8x1xf32>
    %3 = vector.extract_strided_slice %1 {offsets = [0, 0], sizes = [1, 64], strides = [1, 1]} : vector<4x64xf32> to vector<1x64xf32>
    %4 = vector.broadcast %2 : vector<8x1xf32> to vector<8x64xf32>
    %5 = vector.broadcast %3 : vector<1x64xf32> to vector<8x64xf32>
    %6 = arith.mulf %4, %5 : vector<8x64xf32>
    %7 = vector.extract_strided_slice %0 {offsets = [0, 1], sizes = [8, 1], strides = [1, 1]} : vector<8x4xf32> to vector<8x1xf32>
    %8 = vector.extract_strided_slice %1 {offsets = [1, 0], sizes = [1, 64], strides = [1, 1]} : vector<4x64xf32> to vector<1x64xf32>
    %9 = vector.broadcast %7 : vector<8x1xf32> to vector<8x64xf32>
    %10 = vector.broadcast %8 : vector<1x64xf32> to vector<8x64xf32>
    %11 = arith.mulf %9, %10 : vector<8x64xf32>
    %12 = arith.addf %6, %11 : vector<8x64xf32>
    %13 = vector.extract_strided_slice %0 {offsets = [0, 2], sizes = [8, 1], strides = [1, 1]} : vector<8x4xf32> to vector<8x1xf32>
    %14 = vector.extract_strided_slice %1 {offsets = [2, 0], sizes = [1, 64], strides = [1, 1]} : vector<4x64xf32> to vector<1x64xf32>
    %15 = vector.broadcast %13 : vector<8x1xf32> to vector<8x64xf32>
    %16 = vector.broadcast %14 : vector<1x64xf32> to vector<8x64xf32>
    %17 = arith.mulf %15, %16 : vector<8x64xf32>
    %18 = arith.addf %12, %17 : vector<8x64xf32>
    %19 = vector.extract_strided_slice %0 {offsets = [0, 3], sizes = [8, 1], strides = [1, 1]} : vector<8x4xf32> to vector<8x1xf32>
    %20 = vector.extract_strided_slice %1 {offsets = [3, 0], sizes = [1, 64], strides = [1, 1]} : vector<4x64xf32> to vector<1x64xf32>
    %21 = vector.broadcast %19 : vector<8x1xf32> to vector<8x64xf32>
    %22 = vector.broadcast %20 : vector<1x64xf32> to vector<8x64xf32>
    %23 = arith.mulf %21, %22 : vector<8x64xf32>
    %24 = arith.addf %18, %23 : vector<8x64xf32>
    %c0_3 = arith.constant 0 : index
    %c0_4 = arith.constant 0 : index
    %25 = vector.load %arg3[%c0_3, %c0_4] : memref<1x64xf32, #tpu.memory_space<vmem>>, vector<1x64xf32>
    %26 = vector.broadcast %25 : vector<1x64xf32> to vector<8x64xf32>
    %27 = arith.addf %24, %26 : vector<8x64xf32>
    %cst = arith.constant dense<0.000000e+00> : vector<8xf32>
    %28 = vector.multi_reduction <add>, %27, %cst [1] : vector<8x64xf32> to vector<8xf32>
    %29 = vector.shape_cast %28 : vector<8xf32> to vector<8x1xf32>
    %cst_5 = arith.constant 6.400000e+01 : f32
    %30 = vector.broadcast %cst_5 : f32 to vector<8x1xf32>
    %31 = arith.divf %29, %30 : vector<8x1xf32>
    %32 = vector.broadcast %31 : vector<8x1xf32> to vector<8x64xf32>
    %33 = arith.subf %27, %32 : vector<8x64xf32>
    %34 = arith.mulf %33, %33 : vector<8x64xf32>
    %cst_6 = arith.constant dense<0.000000e+00> : vector<8xf32>
    %35 = vector.multi_reduction <add>, %34, %cst_6 [1] : vector<8x64xf32> to vector<8xf32>
    %36 = vector.shape_cast %35 : vector<8xf32> to vector<8x1xf32>
    %cst_7 = arith.constant 6.400000e+01 : f32
    %37 = vector.broadcast %cst_7 : f32 to vector<8x1xf32>
    %38 = arith.divf %36, %37 : vector<8x1xf32>
    %cst_8 = arith.constant 9.99999974E-6 : f32
    %39 = vector.broadcast %cst_8 : f32 to vector<8x1xf32>
    %40 = arith.addf %38, %39 : vector<8x1xf32>
    %41 = math.rsqrt %40 : vector<8x1xf32>
    %42 = vector.broadcast %41 : vector<8x1xf32> to vector<8x64xf32>
    %43 = arith.mulf %33, %42 : vector<8x64xf32>
    %cst_9 = arith.constant 0.000000e+00 : f32
    %44 = vector.broadcast %cst_9 : f32 to vector<8x64xf32>
    %45 = arith.maximumf %43, %44 : vector<8x64xf32>
    %c0_10 = arith.constant 0 : index
    %c0_11 = arith.constant 0 : index
    %46 = vector.load %arg4[%c0_10, %c0_11] : memref<64x256xf32, #tpu.memory_space<vmem>>, vector<64x256xf32>
    %cst_12 = arith.constant dense<0.000000e+00> : vector<8x256xf32>
    %47 = tpu.matmul %45, %46, %cst_12 {dimension_numbers = #tpu.dot_dimension_numbers<[1], [0], [0], [1], [0, 0, 1, 1], [], []>} : vector<8x64xf32>, vector<64x256xf32>, vector<8x256xf32> -> vector<8x256xf32>
    %c0_13 = arith.constant 0 : index
    %c0_14 = arith.constant 0 : index
    %48 = vector.load %arg5[%c0_13, %c0_14] : memref<1x256xf32, #tpu.memory_space<vmem>>, vector<1x256xf32>
    %49 = vector.broadcast %48 : vector<1x256xf32> to vector<8x256xf32>
    %50 = arith.addf %47, %49 : vector<8x256xf32>
    %cst_15 = arith.constant 0.000000e+00 : f32
    %51 = vector.broadcast %cst_15 : f32 to vector<8x256xf32>
    %52 = arith.maximumf %50, %51 : vector<8x256xf32>
    %c0_16 = arith.constant 0 : index
    %c0_17 = arith.constant 0 : index
    %53 = vector.load %arg6[%c0_16, %c0_17] : memref<8x256xf32, #tpu.memory_space<vmem>>, vector<8x256xf32>
    tpu.vector_store %arg6[%c0_16, %c0_17], %52 {strides = array<i32>} : memref<8x256xf32, #tpu.memory_space<vmem>>, vector<8x256xf32>,
    return
  }
  func.func @transform_0(%arg0: i32) -> (i32, i32) {
    %c0_i32 = arith.constant 0 : i32
    %c0_i32_0 = arith.constant 0 : i32
    return %arg0, %c0_i32 : i32, i32
  }
  func.func @transform_1(%arg0: i32) -> (i32, i32) {
    %c0_i32 = arith.constant 0 : i32
    %c0_i32_0 = arith.constant 0 : i32
    %c0_i32_1 = arith.constant 0 : i32
    return %c0_i32, %c0_i32_0 : i32, i32
  }
  func.func @transform_2(%arg0: i32) -> (i32, i32) {
    %c0_i32 = arith.constant 0 : i32
    %c0_i32_0 = arith.constant 0 : i32
    %c0_i32_1 = arith.constant 0 : i32
    return %c0_i32, %c0_i32_0 : i32, i32
  }
  func.func @transform_3(%arg0: i32) -> (i32, i32) {
    %c0_i32 = arith.constant 0 : i32
    %c0_i32_0 = arith.constant 0 : i32
    %c0_i32_1 = arith.constant 0 : i32
    return %c0_i32, %c0_i32_0 : i32, i32
  }
  func.func @transform_4(%arg0: i32) -> (i32, i32) {
    %c0_i32 = arith.constant 0 : i32
    %c0_i32_0 = arith.constant 0 : i32
    %c0_i32_1 = arith.constant 0 : i32
    return %c0_i32, %c0_i32_0 : i32, i32
  }
  func.func @transform_5(%arg0: i32) -> (i32, i32) {
    %c0_i32 = arith.constant 0 : i32
    %c0_i32_0 = arith.constant 0 : i32
    return %arg0, %c0_i32 : i32, i32
  }
}

</mosaic_0001>

<bundles_post_ra>
// kernel: tpu_custom_call.1
= control target key start
LH: loop header
LB: loop body
LE: loop exit
PB: predicated region body
PF: predicated region fallthrough
CT: control target
= control target key end

     0   :  { %10 = vsyncpa [#allocation3], 0  ;;  %s396_s0 = inlined_call_operand.vmem [shape: f32[8,4], index: 0, kind: input, shape index: {}]   ;;  %s397_s1 = inlined_call_operand.vmem [shape: f32[4,64], index: 1, kind: input, shape index: {}]   ;;  %s398_s2 = inlined_call_operand.vmem [shape: f32[1,64], index: 2, kind: input, shape index: {}]   ;;  %s399_s3 = inlined_call_operand.hbm [shape: f32[64,256], index: 3, kind: input, shape index: {}]   ;;  %s400_s4 = inlined_call_operand.vmem [shape: f32[1,256], index: 4, kind: input, shape index: {}]   ;;  %s401_s5 = inlined_call_operand.hbm [shape: f32[8,256], index: 5, kind: output, shape index: {}]  }
   0x1   :  { %11 = vsyncpa [#allocation4], 0  ;;  %s304_s18 = smov [#allocation2]   ;;  %s256_s22 = scalar_lea.hbm %s399_s3, 2048 }
   0x2   :  { %s23_s19 = sshll.u32 %s304_s18, 4  ;;  %p257_p0 = scmp.ne.s32.totalorder %s399_s3, %s256_s22  ;;  %s24_s19 = int_to_ptr.vmem [resolvable:$true] %s23_s19 }
   0x3   :  { %p260_p1 = scmp.lt.u32.totalorder %s256_s22, %s399_s3 }
   0x5   :  { %p262_p2 = pnand %p260_p1, %p257_p0 }
   0x7   :  { %265 = shalt.err (!%p262_p2)
}
   0x8   :  { %s266_s27 = scalar_lea.vmem %s24_s19, 2048  ;;  %p271_p4 = scmp.lt.s32.totalorder %s24_s19, %s24_s19 }
   0x9   :  { %p267_p3 = scmp.ne.s32.totalorder %s24_s19, %s266_s27  ;;  %p272_p5 = scmp.lt.s32.totalorder %s266_s27, %s266_s27 }
   0xb   :  { %p273_p6 = por %p272_p5, %p271_p4 }
   0xd   :  { %p274_p7 = pnand %p273_p6, %p267_p3 }
   0xf   :  { %277 = shalt.err (!%p274_p7)
}
  0x10   :  { %s305_s28 = smov 256   ;;  %s306_s29 = smov 16  }
  0x11   :  { %29 = dma.hbm_to_vmem [thread:$0]  %s399_s3, 2048, %s24_s19, [#allocation3], %s305_s28, %s305_s28, %s306_s29  }
  0x12   :  { %300 = dma.done.wait [#allocation3], 2048  }
  0x13   :  { %301 = vsyncadd [#allocation3], 4294965248  ;;  %v307_v0 = vmov 0   ;;  %v308_v1 = vmov 2   ;;  %v35_v2 = vld [vmem:[%s396_s0] sm:$0xff]  ;;  %v309_v3 = vmov 1   ;;  %v42_v5 = vlaneseq }
  0x14   :  { %249 = vset.pattern.permute.xlu0 %v307_v0  ;;  %251 = vset.pattern.permute.xlu1 %v308_v1  ;;  %v310_v4 = vmov 3   ;;  %v36_v9 = vld [vmem:[%s397_s1] sm:$0xf]  ;;  %vm85_vm0 = vcmask 523264   ;;  %v102_v35 = vld [vmem:[#allocation2 + $0x8] sm:$0xff]  ;;  %v104_v36 = vld [vmem:[#allocation2 + $0x18] sm:$0xff] }
  0x15   :  { %39 = vperm.xlu0 %249, %v35_v2   ;;  %58 = vperm.xlu1 %251, %v35_v2   ;;  %v358_v6 = vshrl.u32 %v42_v5, 7  ;;  %v222_v26 = vld [vmem:[%s398_s2] ss:$0 sm:$0xff]  ;;  %v224_v37 = vpack.c.bf16 %v104_v36, %v102_v35  ;;  %v103_v39 = vld [vmem:[#allocation2 + $0x10] sm:$0xff]  ;;  %v106_v41 = vld [vmem:[#allocation2 + $0x28] sm:$0xff]  ;;  %v311_v48 = vmov 0.0  }
  0x16   :  { %v101_v38 = vld [vmem:[#allocation2] sm:$0xff]  ;;  %v108_v42 = vld [vmem:[#allocation2 + $0x38] sm:$0xff]  ;;  %v107_v45 = vld [vmem:[#allocation2 + $0x30] sm:$0xff]  ;;  %196 = vmatprep.mubr.f32.mxu0 %v311_v48  ;;  %s312_s11 = smov [#allocation5]  }
  0x17   :  { %v44_v7 = vsub.s32 0, %v358_v6  ;;  %v53_v8 = vsub.s32 1, %v358_v6  ;;  %v63_v11 = vsub.s32 2, %v358_v6  ;;  %v73_v13 = vsub.s32 3, %v358_v6  ;;  %225 = vmatprep.subr.bf16.mxu0 %v224_v37  ;;  %v105_v43 = vld [vmem:[#allocation2 + $0x20] sm:$0xff]  ;;  %v110_v46 = vld [vmem:[#allocation2 + $0x48] sm:$0xff] }
  0x18   :  { %v226_v40 = vpack.c.bf16 %v103_v39, %v101_v38  ;;  %v228_v44 = vpack.c.bf16 %v108_v42, %v106_v41  ;;  %v112_v47 = vld [vmem:[#allocation2 + $0x58] sm:$0xff]  ;;  %v230_v49 = vpack.c.bf16 %v107_v45, %v105_v43  ;;  %v109_v51 = vld [vmem:[#allocation2 + $0x40] sm:$0xff]  ;;  %v111_v52 = vld [vmem:[#allocation2 + $0x50] sm:$0xff]  ;;  %s213_s12 = sshll.u32 %s312_s11, 4  ;;  %s214_s12 = int_to_ptr.vmem [resolvable:$true] %s213_s12 }
  0x19   :  { %250 = vset.pattern.permute.xlu0 %v309_v3  ;;  %252 = vset.pattern.permute.xlu1 %v310_v4  ;;  %v45_v14 = vrot.slane %v36_v9, %v44_v7  ;;  %v54_v15 = vrot.slane %v36_v9, %v53_v8  ;;  %v64_v16 = vrot.slane %v36_v9, %v63_v11  ;;  %v114_v53 = vld [vmem:[#allocation2 + $0x68] sm:$0xff]  ;;  %v116_v54 = vld [vmem:[#allocation2 + $0x78] sm:$0xff]  ;;  %v113_v57 = vld [vmem:[#allocation2 + $0x60] sm:$0xff]  ;;  %s278_s13 = scalar_lea.vmem %s214_s12, 256  ;;  %p283_p9 = scmp.lt.s32.totalorder %s214_s12, %s214_s12 }
  0x1a   :  { %48 = vperm.xlu0 %250, %v35_v2   ;;  %68 = vperm.xlu1 %252, %v35_v2   ;;  %v74_v17 = vrot.slane %v36_v9, %v73_v13  ;;  %v232_v50 = vpack.c.bf16 %v112_v47, %v110_v46  ;;  %v234_v55 = vpack.c.bf16 %v111_v52, %v109_v51  ;;  %v115_v58 = vld [vmem:[#allocation2 + $0x70] sm:$0xff]  ;;  %v117_v2 = vld [vmem:[%s400_s4] sm:$0x3]  ;;  %p279_p8 = scmp.ne.s32.totalorder %s214_s12, %s278_s13  ;;  %p284_p10 = scmp.lt.s32.totalorder %s278_s13, %s278_s13 }
  0x1b   :  { %227 = vmatpush1.bf16.msra.mxu0 %v226_v40  ;;  %v236_v56 = vpack.c.bf16 %v116_v54, %v114_v53  ;;  %v238_v59 = vpack.c.bf16 %v115_v58, %v113_v57  ;;  %v122_v3 = vrot.slane %v117_v2, %v44_v7 }
  0x1c   :  { %229 = vmatprep.subr.bf16.mxu0 %v228_v44  ;;  %p285_p11 = por %p284_p10, %p283_p9 }
  0x1e   :  { %253 = vset.pattern.permute.xlu0 %v310_v4  ;;  %v126_v4 = vrot.slane %v117_v2, %v53_v8  ;;  %p286_p12 = pnand %p285_p11, %p279_p8 }
  0x1f   :  { %231 = vmatpush1.bf16.msra.mxu0 %v230_v49 }
  0x20   :  { %233 = vmatprep.subr.bf16.mxu0 %v232_v50 }
  0x23   :  { %235 = vmatpush1.bf16.msra.mxu0 %v234_v55 }
  0x24   :  { %237 = vmatprep.subr.bf16.mxu0 %v236_v56 }
  0x27   :  { %239 = vmatpush1.bf16.msra.mxu0 %v238_v59 }
  0x94   :  { %v40_v10 = vpop.permute.xlu0 %39  ;;  %v59_v12 = vpop.permute.xlu1 %58 }
  0x95   :  { %v46_v20 = vmul.f32 %v45_v14, %v40_v10  ;;  %v65_v22 = vmul.f32 %v64_v16, %v59_v12 }
  0x99   :  { %v49_v18 = vpop.permute.xlu0 %48  ;;  %v69_v19 = vpop.permute.xlu1 %68 }
  0x9a   :  { %v55_v21 = vmul.f32 %v54_v15, %v49_v18  ;;  %v75_v24 = vmul.f32 %v74_v17, %v69_v19 }
  0x9c   :  { %v56_v23 = vadd.f32 %v55_v21, %v46_v20 }
  0x9e   :  { %v66_v25 = vadd.f32 %v65_v22, %v56_v23 }
  0xa0   :  { %v76_v27 = vadd.f32 %v75_v24, %v66_v25 }
  0xa2   :  { %v84_v28 = vadd.f32 %v222_v26, %v76_v27 }
  0xa4   :  { %v86_v29 = vsel %vm85_vm0, %v84_v28, 0.0 }
  0xa5   :  { %87 = vadd.xlane.f32.xlu1 %v86_v29 }
 0x132   :  { %v88_v30 = vpop.xlane.xlu1 %87 }
 0x133   :  { %v90_v31 = vmul.f32 0.015625, %v88_v30 }
 0x135   :  { %v91_v32 = vsub.f32 %v84_v28, %v90_v31 }
 0x137   :  { %v92_v33 = vmul.f32 %v91_v32, %v91_v32 }
 0x139   :  { %v93_v34 = vsel %vm85_vm0, %v92_v33, 0.0 }
 0x13a   :  { %94 = vadd.xlane.f32.xlu0 %v93_v34 }
 0x1c7   :  { %v95_v60 = vpop.xlane.xlu0 %94 }
 0x1c8   :  { %v96_v61 = vmul.f32 0.015625, %v95_v60 }
 0x1ca   :  { %v97_v62 = vadd.f32 1e-05, %v96_v61 }
 0x1cc   :  { %254 = vrsqrt.f32 %v97_v62 }
 0x1d6   :  { %v255_v63 = vpop.eup %254 }
 0x1d7   :  { %v99_v0 = vmul.f32 %v255_v63, %v91_v32 }
 0x1d9   :  { %v100_v1 = vmax.f32 %v99_v0, 0.0 }
 0x1db   :  { %223 = vmatmul.mubr.msk.f32.vlgmr.msra.gmra.mrb[0].mxu0 %vm85_vm0, %v100_v1 }
 0x2ae   :  { %v198_v5 = vpop.f32.mrb[0].mxu0 }
 0x2af   :  { %v199_v9 = vadd.f32 %v198_v5, %v122_v3  ;;  %v200_v10 = vpop.f32.mrb[1].mxu0 }
 0x2b0   :  { %v201_v11 = vadd.f32 %v200_v10, %v126_v4 }
 0x2b1   :  { %v203_v12 = vmax.f32 %v199_v9, 0.0 }
 0x2b2   :  { %v204_v13 = vmax.f32 %v201_v11, 0.0 }
 0x2b3   :  { %205 = vst [vmem:[#allocation5] sm:$0xff] %v203_v12 }
 0x2b4   :  { %206 = vst [vmem:[#allocation5 + $0x8] sm:$0xff] %v204_v13 }
 0x2b5   :  { %289 = shalt.err (!%p286_p12)
}
 0x2b6   :  { %s290_s15 = scalar_lea.hbm %s401_s5, 256 }
 0x2b7   :  { %p291_p13 = scmp.ne.s32.totalorder %s401_s5, %s290_s15  ;;  %p294_p0 = scmp.lt.u32.totalorder %s290_s15, %s401_s5 }
 0x2b9   :  { %p296_p1 = pnand %p294_p0, %p291_p13 }
 0x2bb   :  { %299 = shalt.err (!%p296_p1)
}
 0x2bc   :  { %216 = dma.vmem_to_hbm [thread:$0]  %s214_s12, 256, %s401_s5, [#allocation4]  }
 0x2bd   :  { %302 = dma.done.wait [#allocation4], 256  }
 0x2be   :  { %303 = vsyncadd [#allocation4], 4294967040 }
 0x2bf   :  { %220 = vsyncpa [#allocation3], 1 }
 0x2c0   :  { %221 = vsyncpa [#allocation4], 1 }

</bundles_post_ra>
